<compile_context>
chip_gen: v6e
topology: v6e:2x2x1
jax: 0.10.0
libtpu: 0.0.40
codegen_flags: <defaults>
</compile_context>

<pallas_src>
import math
import functools

import jax
import jax.numpy as jnp
from jax.experimental import pallas as pl
from jax.experimental.pallas import tpu as pltpu


def _round_up(x, m):
    return ((x + m - 1) // m) * m


def _cdiv(a, b):
    return (a + b - 1) // b


def _gelu_exact(x):
    # nn.GELU() default = exact erf formulation (kept in f32).
    inv_sqrt2 = jnp.float32(1.0 / math.sqrt(2.0))
    return 0.5 * x * (1.0 + jax.lax.erf(x * inv_sqrt2))


# --------------------------------------------------------------------------
# Kernels
# --------------------------------------------------------------------------

def _mlp_partial(x_ref, w1_ref, b1_ref, w2_ref):
    """f32 partial result gelu(x @ w1 + b1) @ w2 for the current H slice."""
    x = x_ref[...].astype(w1_ref.dtype)
    h = jnp.dot(x, w1_ref[...], preferred_element_type=jnp.float32)
    h = _gelu_exact(h + b1_ref[...])
    return jnp.dot(h.astype(w2_ref.dtype), w2_ref[...],
                   preferred_element_type=jnp.float32)


def mlp_kernel_resident(x_ref, w1_ref, b1_ref, w2_ref, b2_ref, o_ref):
    # 1-D grid over M tiles.  Weight index maps are constant, so the full
    # (padded) weights are DMA'd exactly once and stay resident in VMEM.
    # No accumulator scratch needed: single H step, write o_ref directly.
    out = _mlp_partial(x_ref, w1_ref, b1_ref, w2_ref) + b2_ref[...]
    o_ref[...] = out.astype(o_ref.dtype)


def mlp_kernel_htiled(x_ref, w1_ref, b1_ref, w2_ref, b2_ref, o_ref, acc_ref):
    # 2-D grid (M tiles, H tiles).  The H axis is a reduction into an f32
    # VMEM scratch; output tile is written once on the last H step.
    kh = pl.program_id(1)

    @pl.when(kh == 0)
    def _():
        acc_ref[...] = jnp.zeros_like(acc_ref)

    acc_ref[...] += _mlp_partial(x_ref, w1_ref, b1_ref, w2_ref)

    @pl.when(kh == pl.num_programs(1) - 1)
    def _():
        o_ref[...] = (acc_ref[...] + b2_ref[...]).astype(o_ref.dtype)


# --------------------------------------------------------------------------
# Tiling / VMEM budgeting
# --------------------------------------------------------------------------

@functools.lru_cache(maxsize=1)
def _vmem_limit_bytes():
    try:
        kind = jax.devices()[0].device_kind.lower()
    except Exception:
        kind = ""
    if "v7" in kind:                 # v7x: 64 MiB physical VMEM per TensorCore
        return 48 * 1024 * 1024
    return 100 * 1024 * 1024         # v5e / v6e: 128 MiB physical


def _vmem_use(tm, th, Cp, x_bytes, c_bytes, o_bytes, n_h):
    use = 2 * tm * Cp * x_bytes              # x tile (double-buffered)
    use += 2 * Cp * th * c_bytes             # W_fc slice (double-buffered)
    use += 2 * th * Cp * c_bytes             # W_proj slice (double-buffered)
    use += 2 * 8 * th * 4 + 2 * 8 * Cp * 4   # biases (sublane-padded)
    use += 2 * tm * Cp * o_bytes             # out tile (double-buffered)
    use += tm * th * (4 + c_bytes)           # (tm, th) f32 intermediate + cast copy
    if n_h > 1:
        use += tm * Cp * 4                   # f32 accumulator scratch
    return use


def _select_tiling(M, Cp, Hp, x_bytes, c_bytes, o_bytes, limit, tm_req, th_req):
    budget = int(0.85 * limit)
    align = 16                                # bf16 sublane packing friendly

    # th: prefer full weight residency (H axis of length 1).
    if th_req is not None:
        th = min(_round_up(th_req, 128), Hp)
    else:
        th = Hp

    # tm: large target (weight-restreaming killer), but keep >=2 M tiles when
    # there is enough work so both v7x TensorCores get a tile.
    if tm_req is not None:
        tm = min(_round_up(tm_req, align), _round_up(M, align))
    else:
        tm = min(1024, _round_up(M, align))
        if M >= 2 * align and _cdiv(M, tm) < 2:
            tm = _round_up(_cdiv(M, 2), align)

    def use(tm_, th_):
        return _vmem_use(tm_, th_, Cp, x_bytes, c_bytes, o_bytes, _cdiv(Hp, th_))

    # Shrink to fit VMEM: first tm (down to 256), then th (down to 256).
    # Weight residency is worth more than an extra-large M tile.
    while use(tm, th) > budget:
        if tm_req is None and tm > 256:
            tm = max(256, _round_up(tm // 2, align))
        elif th_req is None and th > 256:
            th = max(256, _round_up(th // 2, 128))
        else:
            break
    return tm, th


# --------------------------------------------------------------------------
# Wrappers
# --------------------------------------------------------------------------

def prepare_mlp_weights(w_fc, b_fc, w_proj, b_proj, compute_dtype=jnp.bfloat16):
    """One-time (outside the hot path) pad-to-128 + cast of the weights.

    PyTorch Linear weights are (out, in); pass them already transposed to
    (in, out): w_fc (C, 4C), w_proj (4C, C).
    """
    C, H = w_fc.shape
    Cp, Hp = _round_up(C, 128), _round_up(H, 128)
    w1 = jnp.pad(w_fc, ((0, Cp - C), (0, Hp - H))).astype(compute_dtype)
    w2 = jnp.pad(w_proj, ((0, Hp - H), (0, Cp - C))).astype(compute_dtype)
    b1 = jnp.pad(b_fc.astype(jnp.float32), (0, Hp - H)).reshape(1, Hp)
    b2 = jnp.pad(b_proj.astype(jnp.float32), (0, Cp - C)).reshape(1, Cp)
    return w1, b1, w2, b2


@functools.partial(jax.jit, static_argnames=("tm", "th"))
def mlp_forward(x, w1, b1, w2, b2, *, tm=None, th=None):
    """Fused MLP forward.  x: (..., C); weights from prepare_mlp_weights."""
    *lead, C = x.shape
    M = 1
    for d in lead:
        M *= d
    Cp, Hp = w1.shape
    assert Cp == _round_up(C, 128) and w2.shape == (Hp, Cp)

    x_bytes = jnp.dtype(x.dtype).itemsize
    c_bytes = jnp.dtype(w1.dtype).itemsize
    o_bytes = x_bytes                        # output written in x.dtype
    limit = _vmem_limit_bytes()

    tm_sel, th_sel = _select_tiling(M, Cp, Hp, x_bytes, c_bytes, o_bytes,
                                    limit, tm, th)

    Mp = _round_up(M, tm_sel)
    Hpp = _round_up(Hp, th_sel)
    n_h = Hpp // th_sel
    m_tiles = Mp // tm_sel

    # Only pad when actually needed (real GPT dims are already 128-aligned,
    # so this is a pure reshape in the common case).
    x2d = x.reshape(M, C)
    if (Mp, Cp) != (M, C):
        x2d = jnp.pad(x2d, ((0, Mp - M), (0, Cp - C)))
    if Hpp != Hp:                            # only if a user th doesn't divide Hp
        w1 = jnp.pad(w1, ((0, 0), (0, Hpp - Hp)))
        w2 = jnp.pad(w2, ((0, Hpp - Hp), (0, 0)))
        b1 = jnp.pad(b1, ((0, 0), (0, Hpp - Hp)))

    # Weight HBM traffic: once total when resident, once per M tile when tiled.
    w_sweeps = 1 if n_h == 1 else m_tiles
    cost = pl.CostEstimate(
        flops=4 * Mp * Cp * Hpp,
        transcendentals=Mp * Hpp,
        bytes_accessed=(Mp * Cp * x_bytes + Mp * Cp * o_bytes
                        + w_sweeps * 2 * Cp * Hpp * c_bytes
                        + Hpp * 4 + Cp * 4),
    )
    cparams = pltpu.CompilerParams(
        dimension_semantics=("parallel",) if n_h == 1 else ("parallel", "arbitrary"),
        vmem_limit_bytes=limit,
    )
    out_shape = jax.ShapeDtypeStruct((Mp, Cp), x.dtype)

    if n_h == 1:
        out2d = pl.pallas_call(
            mlp_kernel_resident,
            out_shape=out_shape,
            grid_spec=pltpu.PrefetchScalarGridSpec(
                num_scalar_prefetch=0,
                grid=(m_tiles,),
                in_specs=[
                    pl.BlockSpec((tm_sel, Cp), lambda i: (i, 0)),   # x tile
                    pl.BlockSpec((Cp, Hpp), lambda i: (0, 0)),      # W_fc (resident)
                    pl.BlockSpec((1, Hpp), lambda i: (0, 0)),       # b_fc
                    pl.BlockSpec((Hpp, Cp), lambda i: (0, 0)),      # W_proj (resident)
                    pl.BlockSpec((1, Cp), lambda i: (0, 0)),        # b_proj
                ],
                out_specs=pl.BlockSpec((tm_sel, Cp), lambda i: (i, 0)),
            ),
            compiler_params=cparams,
            cost_estimate=cost,
        )(x2d, w1, b1, w2, b2)
    else:
        out2d = pl.pallas_call(
            mlp_kernel_htiled,
            out_shape=out_shape,
            grid_spec=pltpu.PrefetchScalarGridSpec(
                num_scalar_prefetch=0,
                grid=(m_tiles, n_h),
                in_specs=[
                    pl.BlockSpec((tm_sel, Cp), lambda i, k: (i, 0)),   # x tile
                    pl.BlockSpec((Cp, th_sel), lambda i, k: (0, k)),   # W_fc H-slice
                    pl.BlockSpec((1, th_sel), lambda i, k: (0, k)),    # b_fc H-slice
                    pl.BlockSpec((th_sel, Cp), lambda i, k: (k, 0)),   # W_proj H-slice
                    pl.BlockSpec((1, Cp), lambda i, k: (0, 0)),        # b_proj
                ],
                out_specs=pl.BlockSpec((tm_sel, Cp), lambda i, k: (i, 0)),
                scratch_shapes=[pltpu.VMEM((tm_sel, Cp), jnp.float32)],
            ),
            compiler_params=cparams,
            cost_estimate=cost,
        )(x2d, w1, b1, w2, b2)

    return out2d[:M, :C].reshape(*lead, C)


def mlp_reference(x, w_fc, b_fc, w_proj, b_proj):
    h = _gelu_exact(jnp.dot(x, w_fc) + b_fc)
    return jnp.dot(h, w_proj) + b_proj


# --------------------------------------------------------------------------
# Test
# --------------------------------------------------------------------------

if __name__ == "__main__":
    # cfg: n_embed=32, bias=True, dropout=0.0 (eval).  batch=2, seq=8.
    B, T, C = 2, 8, 32
    H = 4 * C

    key = jax.random.PRNGKey(0)
    kx, k1, k2, k3, k4 = jax.random.split(key, 5)

    x = jax.random.normal(kx, (B, T, C), dtype=jnp.float32)
    # PyTorch Linear weight is (out, in); stored transposed (in, out) here.
    w_fc = jax.random.normal(k1, (C, H), jnp.float32) * (1.0 / math.sqrt(C))
    b_fc = jax.random.normal(k2, (H,), jnp.float32) * 0.01
    w_proj = jax.random.normal(k3, (H, C), jnp.float32) * (1.0 / math.sqrt(H))
    b_proj = jax.random.normal(k4, (C,), jnp.float32) * 0.01

    ref = mlp_reference(x, w_fc, b_fc, w_proj, b_proj)

    # f32 parity path (exact vs reference; exercises weight-resident kernel).
    p_f32 = prepare_mlp_weights(w_fc, b_fc, w_proj, b_proj,
                                compute_dtype=jnp.float32)
    out_f32 = jax.block_until_ready(mlp_forward(x, *p_f32))
    assert out_f32.shape == (B, T, C)
    assert jnp.allclose(out_f32, ref, atol=1e-4, rtol=1e-4)

    # bf16-MXU path (default perf config): relaxed tolerance.
    p_bf16 = prepare_mlp_weights(w_fc, b_fc, w_proj, b_proj)
    out_bf16 = jax.block_until_ready(mlp_forward(x, *p_bf16))
    assert out_bf16.shape == (B, T, C)
    assert jnp.allclose(out_bf16, ref, atol=5e-2, rtol=5e-2)

    # Forced H-tiled reduction path (th < Hp, multiple M tiles) for coverage.
    B2, T2, C2 = 2, 16, 128
    H2 = 4 * C2
    kx2, k5, k6, k7, k8 = jax.random.split(jax.random.PRNGKey(1), 5)
    x2 = jax.random.normal(kx2, (B2, T2, C2), jnp.float32)
    w_fc2 = jax.random.normal(k5, (C2, H2), jnp.float32) * (1.0 / math.sqrt(C2))
    b_fc2 = jax.random.normal(k6, (H2,), jnp.float32) * 0.01
    w_proj2 = jax.random.normal(k7, (H2, C2), jnp.float32) * (1.0 / math.sqrt(H2))
    b_proj2 = jax.random.normal(k8, (C2,), jnp.float32) * 0.01
    ref2 = mlp_reference(x2, w_fc2, b_fc2, w_proj2, b_proj2)
    p2 = prepare_mlp_weights(w_fc2, b_fc2, w_proj2, b_proj2,
                             compute_dtype=jnp.float32)
    out2 = jax.block_until_ready(mlp_forward(x2, *p2, tm=16, th=128))
    assert out2.shape == (B2, T2, C2)
    assert jnp.allclose(out2, ref2, atol=1e-4, rtol=1e-4)

    print("KERNEL_OK")
</pallas_src>

<mosaic_0001>
module attributes {stable_mosaic.version = 11 : i64} {
  func.func @mlp_kernel_resident(%arg0: i32, %arg1: memref<16x128xf32, #tpu.memory_space<vmem>>, %arg2: memref<128x128xf32, #tpu.memory_space<vmem>>, %arg3: memref<1x128xf32, #tpu.memory_space<vmem>>, %arg4: memref<128x128xf32, #tpu.memory_space<vmem>>, %arg5: memref<1x128xf32, #tpu.memory_space<vmem>>, %arg6: memref<16x128xf32, #tpu.memory_space<vmem>>) attributes {dimension_semantics = [#tpu.dimension_semantics<parallel>], iteration_bounds = array<i64: 1>, scalar_prefetch = 0 : i64, scratch_operands = 0 : i64, tpu.core_type = #tpu.core_type<tc>, window_params = [{transform_indices = @transform_0, window_bounds = array<i64: 16, 128>}, {pipeline_mode = #tpu.pipeline_mode<synchronous>, transform_indices = @transform_1, window_bounds = array<i64: 128, 128>}, {pipeline_mode = #tpu.pipeline_mode<synchronous>, transform_indices = @transform_2, window_bounds = array<i64: 1, 128>}, {pipeline_mode = #tpu.pipeline_mode<synchronous>, transform_indices = @transform_3, window_bounds = array<i64: 128, 128>}, {pipeline_mode = #tpu.pipeline_mode<synchronous>, transform_indices = @transform_4, window_bounds = array<i64: 1, 128>}, {transform_indices = @transform_5, window_bounds = array<i64: 16, 128>}]} {
    %c0 = arith.constant 0 : index
    %c0_0 = arith.constant 0 : index
    %0 = vector.load %arg1[%c0, %c0_0] : memref<16x128xf32, #tpu.memory_space<vmem>>, vector<16x128xf32>
    %c0_1 = arith.constant 0 : index
    %c0_2 = arith.constant 0 : index
    %1 = vector.load %arg2[%c0_1, %c0_2] : memref<128x128xf32, #tpu.memory_space<vmem>>, vector<128x128xf32>
    %cst = arith.constant dense<0.000000e+00> : vector<16x128xf32>
    %2 = tpu.matmul %0, %1, %cst {dimension_numbers = #tpu.dot_dimension_numbers<[1], [0], [0], [1], [0, 0, 1, 1], [], []>} : vector<16x128xf32>, vector<128x128xf32>, vector<16x128xf32> -> vector<16x128xf32>
    %c0_3 = arith.constant 0 : index
    %c0_4 = arith.constant 0 : index
    %3 = vector.load %arg3[%c0_3, %c0_4] : memref<1x128xf32, #tpu.memory_space<vmem>>, vector<1x128xf32>
    %4 = vector.broadcast %3 : vector<1x128xf32> to vector<16x128xf32>
    %5 = arith.addf %2, %4 : vector<16x128xf32>
    %cst_5 = arith.constant 5.000000e-01 : f32
    %6 = vector.broadcast %cst_5 : f32 to vector<16x128xf32>
    %7 = arith.mulf %6, %5 : vector<16x128xf32>
    %cst_6 = arith.constant 0.707106769 : f32
    %8 = vector.broadcast %cst_6 : f32 to vector<16x128xf32>
    %9 = arith.mulf %5, %8 : vector<16x128xf32>
    %10 = math.erf %9 : vector<16x128xf32>
    %cst_7 = arith.constant 1.000000e+00 : f32
    %11 = vector.broadcast %cst_7 : f32 to vector<16x128xf32>
    %12 = arith.addf %11, %10 : vector<16x128xf32>
    %13 = arith.mulf %7, %12 : vector<16x128xf32>
    %c0_8 = arith.constant 0 : index
    %c0_9 = arith.constant 0 : index
    %14 = vector.load %arg4[%c0_8, %c0_9] : memref<128x128xf32, #tpu.memory_space<vmem>>, vector<128x128xf32>
    %cst_10 = arith.constant dense<0.000000e+00> : vector<16x128xf32>
    %15 = tpu.matmul %13, %14, %cst_10 {dimension_numbers = #tpu.dot_dimension_numbers<[1], [0], [0], [1], [0, 0, 1, 1], [], []>} : vector<16x128xf32>, vector<128x128xf32>, vector<16x128xf32> -> vector<16x128xf32>
    %c0_11 = arith.constant 0 : index
    %c0_12 = arith.constant 0 : index
    %16 = vector.load %arg5[%c0_11, %c0_12] : memref<1x128xf32, #tpu.memory_space<vmem>>, vector<1x128xf32>
    %17 = vector.broadcast %16 : vector<1x128xf32> to vector<16x128xf32>
    %18 = arith.addf %15, %17 : vector<16x128xf32>
    %c0_13 = arith.constant 0 : index
    %c0_14 = arith.constant 0 : index
    %19 = vector.load %arg6[%c0_13, %c0_14] : memref<16x128xf32, #tpu.memory_space<vmem>>, vector<16x128xf32>
    tpu.vector_store %arg6[%c0_13, %c0_14], %18 {strides = array<i32>} : memref<16x128xf32, #tpu.memory_space<vmem>>, vector<16x128xf32>,
    return
  }
  func.func @transform_0(%arg0: i32) -> (i32, i32) {
    %c0_i32 = arith.constant 0 : i32
    %c0_i32_0 = arith.constant 0 : i32
    return %arg0, %c0_i32 : i32, i32
  }
  func.func @transform_1(%arg0: i32) -> (i32, i32) {
    %c0_i32 = arith.constant 0 : i32
    %c0_i32_0 = arith.constant 0 : i32
    %c0_i32_1 = arith.constant 0 : i32
    return %c0_i32, %c0_i32_0 : i32, i32
  }
  func.func @transform_2(%arg0: i32) -> (i32, i32) {
    %c0_i32 = arith.constant 0 : i32
    %c0_i32_0 = arith.constant 0 : i32
    %c0_i32_1 = arith.constant 0 : i32
    return %c0_i32, %c0_i32_0 : i32, i32
  }
  func.func @transform_3(%arg0: i32) -> (i32, i32) {
    %c0_i32 = arith.constant 0 : i32
    %c0_i32_0 = arith.constant 0 : i32
    %c0_i32_1 = arith.constant 0 : i32
    return %c0_i32, %c0_i32_0 : i32, i32
  }
  func.func @transform_4(%arg0: i32) -> (i32, i32) {
    %c0_i32 = arith.constant 0 : i32
    %c0_i32_0 = arith.constant 0 : i32
    %c0_i32_1 = arith.constant 0 : i32
    return %c0_i32, %c0_i32_0 : i32, i32
  }
  func.func @transform_5(%arg0: i32) -> (i32, i32) {
    %c0_i32 = arith.constant 0 : i32
    %c0_i32_0 = arith.constant 0 : i32
    return %arg0, %c0_i32 : i32, i32
  }
}

</mosaic_0001>

<bundles_post_ra>
// kernel: mlp_forward.1
= control target key start
LH: loop header
LB: loop body
LE: loop exit
PB: predicated region body
PF: predicated region fallthrough
CT: control target
= control target key end

     0   :  { %10 = vsyncpa [#allocation3], 0  ;;  %s482_s0 = inlined_call_operand.vmem [shape: f32[16,128], index: 0, kind: input, shape index: {}]   ;;  %s483_s1 = inlined_call_operand.hbm [shape: f32[128,128], index: 1, kind: input, shape index: {}]   ;;  %s484_s2 = inlined_call_operand.vmem [shape: f32[1,128], index: 2, kind: input, shape index: {}]   ;;  %s485_s3 = inlined_call_operand.hbm [shape: f32[128,128], index: 3, kind: input, shape index: {}]   ;;  %s486_s4 = inlined_call_operand.vmem [shape: f32[1,128], index: 4, kind: input, shape index: {}]   ;;  %s487_s5 = inlined_call_operand.vmem [shape: f32[16,128], index: 5, kind: output, shape index: {}]  }
   0x1   :  { %11 = vsyncpa [#allocation5], 0  ;;  %s424_s18 = smov [#allocation2]  }
   0x2   :  { %s19_s19 = sshll.u32 %s424_s18, 4  ;;  %s20_s19 = int_to_ptr.vmem [resolvable:$true] %s19_s19 }
   0x3   :  { %s388_s20 = scalar_lea.vmem %s20_s19, 2048  ;;  %p393_p1 = scmp.lt.s32.totalorder %s20_s19, %s20_s19 }
   0x4   :  { %p389_p0 = scmp.ne.s32.totalorder %s20_s19, %s388_s20  ;;  %p394_p2 = scmp.lt.s32.totalorder %s388_s20, %s388_s20 }
   0x6   :  { %p395_p3 = por %p394_p2, %p393_p1 }
   0x8   :  { %p396_p4 = pnand %p395_p3, %p389_p0 }
   0xa   :  { %399 = shalt.err (!%p396_p4)
}
   0xb   :  { %s425_s21 = smov 128   ;;  %s426_s22 = smov 8  }
   0xc   :  { %25 = dma.hbm_to_vmem [thread:$0]  %s483_s1, 2048, %s20_s19, [#allocation3], %s425_s21, %s425_s21, %s426_s22  }
   0xd   :  { %s427_s25 = smov [#allocation4]  }
   0xe   :  { %s33_s26 = sshll.u32 %s427_s25, 4  ;;  %s34_s26 = int_to_ptr.vmem [resolvable:$true] %s33_s26 }
   0xf   :  { %s408_s27 = scalar_lea.vmem %s34_s26, 2048  ;;  %p413_p6 = scmp.lt.s32.totalorder %s34_s26, %s34_s26 }
  0x10   :  { %p409_p5 = scmp.ne.s32.totalorder %s34_s26, %s408_s27  ;;  %p414_p7 = scmp.lt.s32.totalorder %s408_s27, %s408_s27 }
  0x12   :  { %p415_p8 = por %p414_p7, %p413_p6 }
  0x14   :  { %p416_p9 = pnand %p415_p8, %p409_p5 }
  0x16   :  { %419 = shalt.err (!%p416_p9)
}
  0x17   :  { %39 = dma.hbm_to_vmem [thread:$0]  %s485_s3, 2048, %s34_s26, [#allocation5], %s425_s21, %s425_s21, %s426_s22  }
  0x18   :  { %420 = dma.done.wait [#allocation3], 2048  }
  0x19   :  { %421 = vsyncadd [#allocation3], 4294965248 }
  0x1a   :  { %422 = dma.done.wait [#allocation5], 2048  }
  0x1b   :  { %423 = vsyncadd [#allocation5], 4294965248  ;;  %v65_v0 = vld [vmem:[#allocation2 + $0x78] sm:$0xff]  ;;  %v64_v1 = vld [vmem:[#allocation2 + $0x70] sm:$0xff] }
  0x1c   :  { %302 = vmatprep.subr.mxu0 %v65_v0  ;;  %v63_v2 = vld [vmem:[#allocation2 + $0x68] sm:$0xff]  ;;  %v62_v3 = vld [vmem:[#allocation2 + $0x60] sm:$0xff]  ;;  %v61_v5 = vld [vmem:[#allocation2 + $0x58] sm:$0xff] }
  0x1d   :  { %303 = vmatpush3.msra.mxu0 %v65_v0  ;;  %v48_v4 = vld [vmem:[%s482_s0] sm:$0xff]  ;;  %v173_v6 = vld [vmem:[#allocation4 + $0x78] sm:$0xff]  ;;  %v172_v7 = vld [vmem:[#allocation4 + $0x70] sm:$0xff] }
  0x1e   :  { %304 = vmatprep.subr.mxu0 %v64_v1  ;;  %334 = vmatprep.mubr.f32.mxu0 %v48_v4  ;;  %v60_v8 = vld [vmem:[#allocation2 + $0x50] sm:$0xff]  ;;  %v171_v9 = vld [vmem:[#allocation4 + $0x68] sm:$0xff]  ;;  %v58_v11 = vld [vmem:[#allocation2 + $0x40] sm:$0xff] }
  0x1f   :  { %305 = vmatpush3.msra.mxu0 %v64_v1  ;;  %337 = vmatprep.subr.mxu1 %v173_v6  ;;  %v59_v10 = vld [vmem:[#allocation2 + $0x48] sm:$0xff]  ;;  %v57_v12 = vld [vmem:[#allocation2 + $0x38] sm:$0xff]  ;;  %v56_v13 = vld [vmem:[#allocation2 + $0x30] sm:$0xff] }
  0x20   :  { %306 = vmatprep.subr.mxu0 %v63_v2  ;;  %338 = vmatpush3.msra.mxu1 %v173_v6  ;;  %v55_v14 = vld [vmem:[#allocation2 + $0x28] sm:$0xff]  ;;  %v54_v15 = vld [vmem:[#allocation2 + $0x20] sm:$0xff]  ;;  %v53_v16 = vld [vmem:[#allocation2 + $0x18] sm:$0xff] }
  0x21   :  { %307 = vmatpush3.msra.mxu0 %v63_v2  ;;  %339 = vmatprep.subr.mxu1 %v172_v7  ;;  %v52_v17 = vld [vmem:[#allocation2 + $0x10] sm:$0xff]  ;;  %v51_v18 = vld [vmem:[#allocation2 + $0x8] sm:$0xff]  ;;  %v50_v19 = vld [vmem:[#allocation2] sm:$0xff] }
  0x22   :  { %308 = vmatprep.subr.mxu0 %v62_v3  ;;  %340 = vmatpush3.msra.mxu1 %v172_v7  ;;  %v49_v20 = vld [vmem:[%s482_s0 + $0x8] sm:$0xff]  ;;  %v170_v21 = vld [vmem:[#allocation4 + $0x60] sm:$0xff]  ;;  %v169_v22 = vld [vmem:[#allocation4 + $0x58] sm:$0xff] }
  0x23   :  { %309 = vmatpush3.msra.mxu0 %v62_v3  ;;  %341 = vmatprep.subr.mxu1 %v171_v9  ;;  %v168_v23 = vld [vmem:[#allocation4 + $0x50] sm:$0xff]  ;;  %v167_v24 = vld [vmem:[#allocation4 + $0x48] sm:$0xff]  ;;  %v166_v25 = vld [vmem:[#allocation4 + $0x40] sm:$0xff] }
  0x24   :  { %310 = vmatprep.subr.mxu0 %v61_v5  ;;  %342 = vmatpush3.msra.mxu1 %v171_v9  ;;  %v165_v26 = vld [vmem:[#allocation4 + $0x38] sm:$0xff]  ;;  %v164_v27 = vld [vmem:[#allocation4 + $0x30] sm:$0xff]  ;;  %v163_v28 = vld [vmem:[#allocation4 + $0x28] sm:$0xff] }
  0x25   :  { %311 = vmatpush3.msra.mxu0 %v61_v5  ;;  %343 = vmatprep.subr.mxu1 %v170_v21  ;;  %v162_v29 = vld [vmem:[#allocation4 + $0x20] sm:$0xff]  ;;  %v161_v30 = vld [vmem:[#allocation4 + $0x18] sm:$0xff]  ;;  %v160_v31 = vld [vmem:[#allocation4 + $0x10] sm:$0xff] }
  0x26   :  { %312 = vmatprep.subr.mxu0 %v60_v8  ;;  %344 = vmatpush3.msra.mxu1 %v170_v21  ;;  %v159_v32 = vld [vmem:[#allocation4 + $0x8] sm:$0xff]  ;;  %v158_v33 = vld [vmem:[#allocation4] sm:$0xff] }
  0x27   :  { %313 = vmatpush3.msra.mxu0 %v60_v8  ;;  %345 = vmatprep.subr.mxu1 %v169_v22  ;;  %v264_v34 = vld [vmem:[%s484_s2] ss:$0 sm:$0xff] }
  0x28   :  { %314 = vmatprep.subr.mxu0 %v59_v10  ;;  %346 = vmatpush3.msra.mxu1 %v169_v22  ;;  %v265_v49 = vld [vmem:[%s486_s4] ss:$0 sm:$0xff] }
  0x29   :  { %315 = vmatpush3.msra.mxu0 %v59_v10  ;;  %347 = vmatprep.subr.mxu1 %v168_v23 }
  0x2a   :  { %316 = vmatprep.subr.mxu0 %v58_v11  ;;  %348 = vmatpush3.msra.mxu1 %v168_v23 }
  0x2b   :  { %317 = vmatpush3.msra.mxu0 %v58_v11  ;;  %349 = vmatprep.subr.mxu1 %v167_v24 }
  0x2c   :  { %318 = vmatprep.subr.mxu0 %v57_v12  ;;  %350 = vmatpush3.msra.mxu1 %v167_v24 }
  0x2d   :  { %319 = vmatpush3.msra.mxu0 %v57_v12  ;;  %351 = vmatprep.subr.mxu1 %v166_v25 }
  0x2e   :  { %320 = vmatprep.subr.mxu0 %v56_v13  ;;  %352 = vmatpush3.msra.mxu1 %v166_v25 }
  0x2f   :  { %321 = vmatpush3.msra.mxu0 %v56_v13  ;;  %353 = vmatprep.subr.mxu1 %v165_v26 }
  0x30   :  { %322 = vmatprep.subr.mxu0 %v55_v14  ;;  %354 = vmatpush3.msra.mxu1 %v165_v26 }
  0x31   :  { %323 = vmatpush3.msra.mxu0 %v55_v14  ;;  %355 = vmatprep.subr.mxu1 %v164_v27 }
  0x32   :  { %324 = vmatprep.subr.mxu0 %v54_v15  ;;  %356 = vmatpush3.msra.mxu1 %v164_v27 }
  0x33   :  { %325 = vmatpush3.msra.mxu0 %v54_v15  ;;  %357 = vmatprep.subr.mxu1 %v163_v28 }
  0x34   :  { %326 = vmatprep.subr.mxu0 %v53_v16  ;;  %358 = vmatpush3.msra.mxu1 %v163_v28 }
  0x35   :  { %327 = vmatpush3.msra.mxu0 %v53_v16  ;;  %359 = vmatprep.subr.mxu1 %v162_v29 }
  0x36   :  { %328 = vmatprep.subr.mxu0 %v52_v17  ;;  %360 = vmatpush3.msra.mxu1 %v162_v29 }
  0x37   :  { %329 = vmatpush3.msra.mxu0 %v52_v17  ;;  %361 = vmatprep.subr.mxu1 %v161_v30 }
  0x38   :  { %330 = vmatprep.subr.mxu0 %v51_v18  ;;  %362 = vmatpush3.msra.mxu1 %v161_v30 }
  0x39   :  { %331 = vmatpush3.msra.mxu0 %v51_v18  ;;  %363 = vmatprep.subr.mxu1 %v160_v31 }
  0x3a   :  { %332 = vmatprep.subr.mxu0 %v50_v19  ;;  %364 = vmatpush3.msra.mxu1 %v160_v31 }
  0x3b   :  { %333 = vmatpush3.msra.mxu0 %v50_v19  ;;  %365 = vmatprep.subr.mxu1 %v159_v32 }
  0x3c   :  { %335 = vmatmul.mubr.f32.vlgmr.msra.gmra.mxu0 %v49_v20  ;;  %366 = vmatpush3.msra.mxu1 %v159_v32 }
  0x3d   :  { %367 = vmatprep.subr.mxu1 %v158_v33 }
  0x3e   :  { %368 = vmatpush3.msra.mxu1 %v158_v33 }
  0xfc   :  { %v336_v35 = vpop.f32.mrf.mxu0 }
  0xfd   :  { %v145_v36 = vadd.f32 %v336_v35, %v264_v34 }
  0xfe   :  { %v139_v37 = vpop.f32.mrf.mxu0 }
  0xff   :  { %v151_v38 = vmul.f32 0.70710677, %v145_v36  ;;  %v140_v39 = vadd.f32 %v264_v34, %v139_v37  ;;  %v149_v46 = vmul.f32 0.5, %v145_v36 }
 0x101   :  { %376 = verf.f32 %v151_v38  ;;  %v150_v40 = vmul.f32 0.70710677, %v140_v39  ;;  %v148_v44 = vmul.f32 0.5, %v140_v39 }
 0x103   :  { %378 = verf.f32 %v150_v40 }
 0x10e   :  { %v377_v41 = vpop.eup %376 }
 0x10f   :  { %v155_v43 = vadd.f32 1.0, %v377_v41 }
 0x110   :  { %v379_v42 = vpop.eup %378 }
 0x111   :  { %v154_v45 = vadd.f32 1.0, %v379_v42  ;;  %v157_v48 = vmul.f32 %v155_v43, %v149_v46 }
 0x113   :  { %v156_v47 = vmul.f32 %v154_v45, %v148_v44 }
 0x115   :  { %369 = vmatprep.mubr.f32.mxu1 %v156_v47 }
 0x116   :  { %370 = vmatmul.mubr.f32.vlgmr.msra.gmra.mxu1 %v157_v48 }
 0x1d6   :  { %v371_v50 = vpop.f32.mrf.mxu1 }
 0x1d7   :  { %v253_v51 = vadd.f32 %v371_v50, %v265_v49 }
 0x1d8   :  { %v247_v52 = vpop.f32.mrf.mxu1 }
 0x1d9   :  { %257 = vst [vmem:[%s487_s5 + $0x8] sm:$0xff] %v253_v51  ;;  %v248_v53 = vadd.f32 %v265_v49, %v247_v52 }
 0x1db   :  { %256 = vst [vmem:[%s487_s5] sm:$0xff] %v248_v53 }
 0x1dc   :  { %262 = vsyncpa [#allocation3], 1 }
 0x1dd   :  { %263 = vsyncpa [#allocation5], 1 }

</bundles_post_ra>
